<compile_context>
chip_gen: v7x
topology: tpu7x:2x2x1
jax: 0.10.0
libtpu: 0.0.40
codegen_flags: <defaults>
</compile_context>

<pallas_src>
import functools

import jax
import jax.numpy as jnp
from jax import lax
from jax.experimental import pallas as pl
from jax.experimental.pallas import tpu as pltpu


def rnn_kernel(x_ref, w_rnn_ref, aux_ref, out_ref):
    seq, batch, in_dim = x_ref.shape
    h_dim = w_rnn_ref.shape[1]
    n_cls = out_ref.shape[1]

    # Hoisted weight / bias loads (static, tile-aligned ref slices, once).
    w_hh = w_rnn_ref[0:h_dim, :]                         # (h, h)  bf16
    w_ih = w_rnn_ref[h_dim:h_dim + in_dim, :]            # (in, h) bf16
    b_rnn = aux_ref[h_dim + 1:h_dim + 2, :]              # (1, h)  f32 (= b_ih+b_hh)

    # Whole x loaded once, cast to bf16 in-kernel (free VPU op under slack).
    x_bf = x_ref[...].astype(jnp.bfloat16)               # (seq, batch, in)

    # Fully-unrolled recurrence. Hidden state carried in f32; cast to bf16
    # only as an MXU operand. tanh stays in f32 (v5e has no bf16 VPU/EUP).
    h = jnp.zeros((batch, h_dim), jnp.float32)
    for t in range(seq):
        # Input projection for step t: aligned leading-axis tile x_bf[t],
        # no dependence on h -> off the serial recurrence critical path.
        xw_t = jnp.dot(x_bf[t], w_ih,
                       preferred_element_type=jnp.float32) + b_rnn   # (b, h) f32
        # Serial part: h_{t-1} @ W_hh^T, add, tanh.
        pre = xw_t + jnp.dot(h.astype(jnp.bfloat16), w_hh,
                             preferred_element_type=jnp.float32)     # (b, h) f32
        h = jnp.tanh(pre)

    # Output projection Linear(h, 5) in f32 (tiny, once).
    w_out_t = aux_ref[0:h_dim, 0:n_cls]                  # (h, 5) f32
    b_out = aux_ref[h_dim:h_dim + 1, 0:n_cls]            # (1, 5) f32
    z = jnp.dot(h, w_out_t, preferred_element_type=jnp.float32) + b_out

    # Numerically stable LogSoftmax over dim=1.
    m = jnp.max(z, axis=1, keepdims=True)
    shifted = z - m
    lse = jnp.log(jnp.sum(jnp.exp(shifted), axis=1, keepdims=True))
    out_ref[...] = shifted - lse


def prepare_params(w_ih, w_hh, b_ih, b_hh, w_out, b_out):
    """One-time (init-time) parameter packing; not on the per-call path.

    Returns:
      w_rnn: (h + in, h) bf16,  rows [0:h) = W_hh^T, rows [h:h+in) = W_ih^T.
      aux:   (h + 2, h) f32,    rows [0:h) cols [0:5) = W_out^T,
                                row  h     cols [0:5) = b_out,
                                row  h+1   cols [0:h) = b_ih + b_hh.
    """
    h_dim, in_dim = w_ih.shape
    n_cls = w_out.shape[0]
    assert n_cls <= h_dim, "aux packing assumes n_cls <= hidden dim"
    w_rnn = jnp.concatenate([w_hh.T, w_ih.T], axis=0).astype(jnp.bfloat16)
    aux = jnp.zeros((h_dim + 2, h_dim), jnp.float32)
    aux = aux.at[0:h_dim, 0:n_cls].set(w_out.T.astype(jnp.float32))
    aux = aux.at[h_dim, 0:n_cls].set(b_out.astype(jnp.float32))
    aux = aux.at[h_dim + 1, :].set((b_ih + b_hh).astype(jnp.float32))
    return w_rnn, aux


@functools.partial(jax.jit, static_argnames=("n_cls",))
def rnn_forward(x, w_rnn, aux, n_cls=5):
    """x: (seq, batch, input_dim) float32 (raw).  Returns (batch, n_cls) log-probs."""
    seq, batch, in_dim = x.shape
    h_dim = w_rnn.shape[1]

    flops = (2 * seq * batch * in_dim * h_dim
             + 2 * seq * batch * h_dim * h_dim
             + 2 * batch * h_dim * n_cls)
    transcendentals = seq * batch * h_dim + batch * n_cls
    bytes_accessed = (x.size * 4 + w_rnn.size * 2 + aux.size * 4
                      + batch * n_cls * 4)

    vmem = pl.BlockSpec(memory_space=pltpu.MemorySpace.VMEM)
    return pl.pallas_call(
        rnn_kernel,
        out_shape=jax.ShapeDtypeStruct((batch, n_cls), jnp.float32),
        in_specs=[vmem, vmem, vmem],
        out_specs=vmem,
        cost_estimate=pl.CostEstimate(flops=flops,
                                      transcendentals=transcendentals,
                                      bytes_accessed=bytes_accessed),
    )(x, w_rnn, aux)


if __name__ == "__main__":
    # Small shapes consistent with the module's forward pass.
    seq, batch, input_dim, h_dim, n_cls = 8, 2, 16, 32, 5

    key = jax.random.PRNGKey(0)
    ks = jax.random.split(key, 8)

    # Deterministic synthetic parameters (uniform(-1/sqrt(h), 1/sqrt(h)),
    # matching PyTorch's default init distribution for nn.RNN / nn.Linear).
    bound = 1.0 / (h_dim ** 0.5)
    w_ih = jax.random.uniform(ks[0], (h_dim, input_dim), jnp.float32, -bound, bound)
    w_hh = jax.random.uniform(ks[1], (h_dim, h_dim), jnp.float32, -bound, bound)
    b_ih = jax.random.uniform(ks[2], (h_dim,), jnp.float32, -bound, bound)
    b_hh = jax.random.uniform(ks[3], (h_dim,), jnp.float32, -bound, bound)
    w_out = jax.random.uniform(ks[4], (n_cls, h_dim), jnp.float32, -bound, bound)
    b_out = jax.random.uniform(ks[5], (n_cls,), jnp.float32, -bound, bound)

    x = jax.random.normal(ks[6], (seq, batch, input_dim), jnp.float32)

    # One-time parameter packing (init-time, off the per-call path).
    w_rnn, aux = prepare_params(w_ih, w_hh, b_ih, b_hh, w_out, b_out)
    w_rnn, aux = jax.block_until_ready((w_rnn, aux))

    out = rnn_forward(x, w_rnn, aux, n_cls=n_cls)
    out = jax.block_until_ready(out)
    assert out.shape == (batch, n_cls)

    # Reference 1: pure-JAX replica of the kernel's exact math (bf16 MXU
    # operands, f32 accumulate, f32 bias adds) -> should match tightly.
    def ref_kernel_math(x):
        x_bf = x.astype(jnp.bfloat16)
        w_ih_bf = w_ih.T.astype(jnp.bfloat16)
        w_hh_bf = w_hh.T.astype(jnp.bfloat16)
        b_rnn = (b_ih + b_hh).reshape(1, h_dim)
        h = jnp.zeros((batch, h_dim), jnp.float32)
        for t in range(seq):
            xw_t = jnp.dot(x_bf[t], w_ih_bf,
                           preferred_element_type=jnp.float32) + b_rnn
            pre = xw_t + jnp.dot(h.astype(jnp.bfloat16), w_hh_bf,
                                 preferred_element_type=jnp.float32)
            h = jnp.tanh(pre)
        z = h @ w_out.T + b_out
        return jax.nn.log_softmax(z, axis=1)

    # Reference 2: full-f32 reference of the original PyTorch semantics
    # (loose tolerance accounts for the intentional bf16 MXU operands).
    def ref_f32(x):
        def step(h, x_t):
            h_new = jnp.tanh(x_t @ w_ih.T + b_ih + h @ w_hh.T + b_hh)
            return h_new, None
        h_last, _ = lax.scan(step, jnp.zeros((batch, h_dim), jnp.float32), x)
        z = h_last @ w_out.T + b_out
        return jax.nn.log_softmax(z, axis=1)

    ref_b = ref_kernel_math(x)
    ref_f = ref_f32(x)
    assert jnp.allclose(out, ref_b, atol=2e-4, rtol=2e-4), (out, ref_b)
    assert jnp.allclose(out, ref_f, atol=5e-2, rtol=5e-2), (out, ref_f)

    print("KERNEL_OK")
</pallas_src>

<mosaic_0001>
module attributes {stable_mosaic.version = 11 : i64} {
  func.func @rnn_kernel(%arg0: memref<8x2x16xf32, #tpu.memory_space<vmem>>, %arg1: memref<48x32xbf16, #tpu.memory_space<vmem>>, %arg2: memref<34x32xf32, #tpu.memory_space<vmem>>, %arg3: memref<2x5xf32, #tpu.memory_space<vmem>>) attributes {dimension_semantics = [], scalar_prefetch = 0 : i64, scratch_operands = 0 : i64, tpu.core_type = #tpu.core_type<tc>} {
    %c0 = arith.constant 0 : index
    %c0_0 = arith.constant 0 : index
    %0 = vector.load %arg1[%c0, %c0_0] : memref<48x32xbf16, #tpu.memory_space<vmem>>, vector<32x32xbf16>
    %c32 = arith.constant 32 : index
    %c0_1 = arith.constant 0 : index
    %1 = vector.load %arg1[%c32, %c0_1] : memref<48x32xbf16, #tpu.memory_space<vmem>>, vector<16x32xbf16>
    %c33 = arith.constant 33 : index
    %c0_2 = arith.constant 0 : index
    %2 = vector.load %arg2[%c33, %c0_2] : memref<34x32xf32, #tpu.memory_space<vmem>>, vector<1x32xf32>
    %c0_3 = arith.constant 0 : index
    %c0_4 = arith.constant 0 : index
    %c0_5 = arith.constant 0 : index
    %3 = vector.load %arg0[%c0_3, %c0_4, %c0_5] : memref<8x2x16xf32, #tpu.memory_space<vmem>>, vector<8x2x16xf32>
    %4 = arith.truncf %3 : vector<8x2x16xf32> to vector<8x2x16xbf16>
    %cst = arith.constant 0.000000e+00 : f32
    %5 = vector.broadcast %cst : f32 to vector<2x32xf32>
    %6 = vector.extract_strided_slice %4 {offsets = [0, 0, 0], sizes = [1, 2, 16], strides = [1, 1, 1]} : vector<8x2x16xbf16> to vector<1x2x16xbf16>
    %7 = vector.shape_cast %6 : vector<1x2x16xbf16> to vector<2x16xbf16>
    %cst_6 = arith.constant dense<0.000000e+00> : vector<2x32xf32>
    %8 = tpu.matmul %7, %1, %cst_6 {dimension_numbers = #tpu.dot_dimension_numbers<[1], [0], [0], [1], [0, 0, 1, 1], [], []>} : vector<2x16xbf16>, vector<16x32xbf16>, vector<2x32xf32> -> vector<2x32xf32>
    %9 = vector.broadcast %2 : vector<1x32xf32> to vector<2x32xf32>
    %10 = arith.addf %8, %9 : vector<2x32xf32>
    %11 = arith.truncf %5 : vector<2x32xf32> to vector<2x32xbf16>
    %cst_7 = arith.constant dense<0.000000e+00> : vector<2x32xf32>
    %12 = tpu.matmul %11, %0, %cst_7 {dimension_numbers = #tpu.dot_dimension_numbers<[1], [0], [0], [1], [0, 0, 1, 1], [], []>} : vector<2x32xbf16>, vector<32x32xbf16>, vector<2x32xf32> -> vector<2x32xf32>
    %13 = arith.addf %10, %12 : vector<2x32xf32>
    %14 = math.tanh %13 : vector<2x32xf32>
    %15 = vector.extract_strided_slice %4 {offsets = [1, 0, 0], sizes = [1, 2, 16], strides = [1, 1, 1]} : vector<8x2x16xbf16> to vector<1x2x16xbf16>
    %16 = vector.shape_cast %15 : vector<1x2x16xbf16> to vector<2x16xbf16>
    %cst_8 = arith.constant dense<0.000000e+00> : vector<2x32xf32>
    %17 = tpu.matmul %16, %1, %cst_8 {dimension_numbers = #tpu.dot_dimension_numbers<[1], [0], [0], [1], [0, 0, 1, 1], [], []>} : vector<2x16xbf16>, vector<16x32xbf16>, vector<2x32xf32> -> vector<2x32xf32>
    %18 = vector.broadcast %2 : vector<1x32xf32> to vector<2x32xf32>
    %19 = arith.addf %17, %18 : vector<2x32xf32>
    %20 = arith.truncf %14 : vector<2x32xf32> to vector<2x32xbf16>
    %cst_9 = arith.constant dense<0.000000e+00> : vector<2x32xf32>
    %21 = tpu.matmul %20, %0, %cst_9 {dimension_numbers = #tpu.dot_dimension_numbers<[1], [0], [0], [1], [0, 0, 1, 1], [], []>} : vector<2x32xbf16>, vector<32x32xbf16>, vector<2x32xf32> -> vector<2x32xf32>
    %22 = arith.addf %19, %21 : vector<2x32xf32>
    %23 = math.tanh %22 : vector<2x32xf32>
    %24 = vector.extract_strided_slice %4 {offsets = [2, 0, 0], sizes = [1, 2, 16], strides = [1, 1, 1]} : vector<8x2x16xbf16> to vector<1x2x16xbf16>
    %25 = vector.shape_cast %24 : vector<1x2x16xbf16> to vector<2x16xbf16>
    %cst_10 = arith.constant dense<0.000000e+00> : vector<2x32xf32>
    %26 = tpu.matmul %25, %1, %cst_10 {dimension_numbers = #tpu.dot_dimension_numbers<[1], [0], [0], [1], [0, 0, 1, 1], [], []>} : vector<2x16xbf16>, vector<16x32xbf16>, vector<2x32xf32> -> vector<2x32xf32>
    %27 = vector.broadcast %2 : vector<1x32xf32> to vector<2x32xf32>
    %28 = arith.addf %26, %27 : vector<2x32xf32>
    %29 = arith.truncf %23 : vector<2x32xf32> to vector<2x32xbf16>
    %cst_11 = arith.constant dense<0.000000e+00> : vector<2x32xf32>
    %30 = tpu.matmul %29, %0, %cst_11 {dimension_numbers = #tpu.dot_dimension_numbers<[1], [0], [0], [1], [0, 0, 1, 1], [], []>} : vector<2x32xbf16>, vector<32x32xbf16>, vector<2x32xf32> -> vector<2x32xf32>
    %31 = arith.addf %28, %30 : vector<2x32xf32>
    %32 = math.tanh %31 : vector<2x32xf32>
    %33 = vector.extract_strided_slice %4 {offsets = [3, 0, 0], sizes = [1, 2, 16], strides = [1, 1, 1]} : vector<8x2x16xbf16> to vector<1x2x16xbf16>
    %34 = vector.shape_cast %33 : vector<1x2x16xbf16> to vector<2x16xbf16>
    %cst_12 = arith.constant dense<0.000000e+00> : vector<2x32xf32>
    %35 = tpu.matmul %34, %1, %cst_12 {dimension_numbers = #tpu.dot_dimension_numbers<[1], [0], [0], [1], [0, 0, 1, 1], [], []>} : vector<2x16xbf16>, vector<16x32xbf16>, vector<2x32xf32> -> vector<2x32xf32>
    %36 = vector.broadcast %2 : vector<1x32xf32> to vector<2x32xf32>
    %37 = arith.addf %35, %36 : vector<2x32xf32>
    %38 = arith.truncf %32 : vector<2x32xf32> to vector<2x32xbf16>
    %cst_13 = arith.constant dense<0.000000e+00> : vector<2x32xf32>
    %39 = tpu.matmul %38, %0, %cst_13 {dimension_numbers = #tpu.dot_dimension_numbers<[1], [0], [0], [1], [0, 0, 1, 1], [], []>} : vector<2x32xbf16>, vector<32x32xbf16>, vector<2x32xf32> -> vector<2x32xf32>
    %40 = arith.addf %37, %39 : vector<2x32xf32>
    %41 = math.tanh %40 : vector<2x32xf32>
    %42 = vector.extract_strided_slice %4 {offsets = [4, 0, 0], sizes = [1, 2, 16], strides = [1, 1, 1]} : vector<8x2x16xbf16> to vector<1x2x16xbf16>
    %43 = vector.shape_cast %42 : vector<1x2x16xbf16> to vector<2x16xbf16>
    %cst_14 = arith.constant dense<0.000000e+00> : vector<2x32xf32>
    %44 = tpu.matmul %43, %1, %cst_14 {dimension_numbers = #tpu.dot_dimension_numbers<[1], [0], [0], [1], [0, 0, 1, 1], [], []>} : vector<2x16xbf16>, vector<16x32xbf16>, vector<2x32xf32> -> vector<2x32xf32>
    %45 = vector.broadcast %2 : vector<1x32xf32> to vector<2x32xf32>
    %46 = arith.addf %44, %45 : vector<2x32xf32>
    %47 = arith.truncf %41 : vector<2x32xf32> to vector<2x32xbf16>
    %cst_15 = arith.constant dense<0.000000e+00> : vector<2x32xf32>
    %48 = tpu.matmul %47, %0, %cst_15 {dimension_numbers = #tpu.dot_dimension_numbers<[1], [0], [0], [1], [0, 0, 1, 1], [], []>} : vector<2x32xbf16>, vector<32x32xbf16>, vector<2x32xf32> -> vector<2x32xf32>
    %49 = arith.addf %46, %48 : vector<2x32xf32>
    %50 = math.tanh %49 : vector<2x32xf32>
    %51 = vector.extract_strided_slice %4 {offsets = [5, 0, 0], sizes = [1, 2, 16], strides = [1, 1, 1]} : vector<8x2x16xbf16> to vector<1x2x16xbf16>
    %52 = vector.shape_cast %51 : vector<1x2x16xbf16> to vector<2x16xbf16>
    %cst_16 = arith.constant dense<0.000000e+00> : vector<2x32xf32>
    %53 = tpu.matmul %52, %1, %cst_16 {dimension_numbers = #tpu.dot_dimension_numbers<[1], [0], [0], [1], [0, 0, 1, 1], [], []>} : vector<2x16xbf16>, vector<16x32xbf16>, vector<2x32xf32> -> vector<2x32xf32>
    %54 = vector.broadcast %2 : vector<1x32xf32> to vector<2x32xf32>
    %55 = arith.addf %53, %54 : vector<2x32xf32>
    %56 = arith.truncf %50 : vector<2x32xf32> to vector<2x32xbf16>
    %cst_17 = arith.constant dense<0.000000e+00> : vector<2x32xf32>
    %57 = tpu.matmul %56, %0, %cst_17 {dimension_numbers = #tpu.dot_dimension_numbers<[1], [0], [0], [1], [0, 0, 1, 1], [], []>} : vector<2x32xbf16>, vector<32x32xbf16>, vector<2x32xf32> -> vector<2x32xf32>
    %58 = arith.addf %55, %57 : vector<2x32xf32>
    %59 = math.tanh %58 : vector<2x32xf32>
    %60 = vector.extract_strided_slice %4 {offsets = [6, 0, 0], sizes = [1, 2, 16], strides = [1, 1, 1]} : vector<8x2x16xbf16> to vector<1x2x16xbf16>
    %61 = vector.shape_cast %60 : vector<1x2x16xbf16> to vector<2x16xbf16>
    %cst_18 = arith.constant dense<0.000000e+00> : vector<2x32xf32>
    %62 = tpu.matmul %61, %1, %cst_18 {dimension_numbers = #tpu.dot_dimension_numbers<[1], [0], [0], [1], [0, 0, 1, 1], [], []>} : vector<2x16xbf16>, vector<16x32xbf16>, vector<2x32xf32> -> vector<2x32xf32>
    %63 = vector.broadcast %2 : vector<1x32xf32> to vector<2x32xf32>
    %64 = arith.addf %62, %63 : vector<2x32xf32>
    %65 = arith.truncf %59 : vector<2x32xf32> to vector<2x32xbf16>
    %cst_19 = arith.constant dense<0.000000e+00> : vector<2x32xf32>
    %66 = tpu.matmul %65, %0, %cst_19 {dimension_numbers = #tpu.dot_dimension_numbers<[1], [0], [0], [1], [0, 0, 1, 1], [], []>} : vector<2x32xbf16>, vector<32x32xbf16>, vector<2x32xf32> -> vector<2x32xf32>
    %67 = arith.addf %64, %66 : vector<2x32xf32>
    %68 = math.tanh %67 : vector<2x32xf32>
    %69 = vector.extract_strided_slice %4 {offsets = [7, 0, 0], sizes = [1, 2, 16], strides = [1, 1, 1]} : vector<8x2x16xbf16> to vector<1x2x16xbf16>
    %70 = vector.shape_cast %69 : vector<1x2x16xbf16> to vector<2x16xbf16>
    %cst_20 = arith.constant dense<0.000000e+00> : vector<2x32xf32>
    %71 = tpu.matmul %70, %1, %cst_20 {dimension_numbers = #tpu.dot_dimension_numbers<[1], [0], [0], [1], [0, 0, 1, 1], [], []>} : vector<2x16xbf16>, vector<16x32xbf16>, vector<2x32xf32> -> vector<2x32xf32>
    %72 = vector.broadcast %2 : vector<1x32xf32> to vector<2x32xf32>
    %73 = arith.addf %71, %72 : vector<2x32xf32>
    %74 = arith.truncf %68 : vector<2x32xf32> to vector<2x32xbf16>
    %cst_21 = arith.constant dense<0.000000e+00> : vector<2x32xf32>
    %75 = tpu.matmul %74, %0, %cst_21 {dimension_numbers = #tpu.dot_dimension_numbers<[1], [0], [0], [1], [0, 0, 1, 1], [], []>} : vector<2x32xbf16>, vector<32x32xbf16>, vector<2x32xf32> -> vector<2x32xf32>
    %76 = arith.addf %73, %75 : vector<2x32xf32>
    %77 = math.tanh %76 : vector<2x32xf32>
    %c0_22 = arith.constant 0 : index
    %c0_23 = arith.constant 0 : index
    %78 = vector.load %arg2[%c0_22, %c0_23] : memref<34x32xf32, #tpu.memory_space<vmem>>, vector<32x5xf32>
    %c32_24 = arith.constant 32 : index
    %c0_25 = arith.constant 0 : index
    %79 = vector.load %arg2[%c32_24, %c0_25] : memref<34x32xf32, #tpu.memory_space<vmem>>, vector<1x5xf32>
    %cst_26 = arith.constant dense<0.000000e+00> : vector<2x5xf32>
    %80 = tpu.matmul %77, %78, %cst_26 {dimension_numbers = #tpu.dot_dimension_numbers<[1], [0], [0], [1], [0, 0, 1, 1], [], []>} : vector<2x32xf32>, vector<32x5xf32>, vector<2x5xf32> -> vector<2x5xf32>
    %81 = vector.broadcast %79 : vector<1x5xf32> to vector<2x5xf32>
    %82 = arith.addf %80, %81 : vector<2x5xf32>
    %cst_27 = arith.constant dense<0xFF800000> : vector<2xf32>
    %83 = vector.multi_reduction <maximumf>, %82, %cst_27 [1] : vector<2x5xf32> to vector<2xf32>
    %84 = vector.shape_cast %83 : vector<2xf32> to vector<2x1xf32>
    %85 = vector.broadcast %84 : vector<2x1xf32> to vector<2x5xf32>
    %86 = arith.subf %82, %85 : vector<2x5xf32>
    %87 = math.exp %86 : vector<2x5xf32>
    %cst_28 = arith.constant dense<0.000000e+00> : vector<2xf32>
    %88 = vector.multi_reduction <add>, %87, %cst_28 [1] : vector<2x5xf32> to vector<2xf32>
    %89 = vector.shape_cast %88 : vector<2xf32> to vector<2x1xf32>
    %90 = math.log %89 : vector<2x1xf32>
    %91 = vector.broadcast %90 : vector<2x1xf32> to vector<2x5xf32>
    %92 = arith.subf %86, %91 : vector<2x5xf32>
    %c0_29 = arith.constant 0 : index
    %c0_30 = arith.constant 0 : index
    %93 = vector.load %arg3[%c0_29, %c0_30] : memref<2x5xf32, #tpu.memory_space<vmem>>, vector<2x5xf32>
    tpu.vector_store %arg3[%c0_29, %c0_30], %92 {strides = array<i32>} : memref<2x5xf32, #tpu.memory_space<vmem>>, vector<2x5xf32>,
    return
  }
}

</mosaic_0001>

<bundles_post_ra>
// kernel: rnn_forward.1
= control target key start
LH: loop header
LB: loop body
LE: loop exit
PB: predicated region body
PF: predicated region fallthrough
CT: control target
= control target key end

     0   :  { %v1171_v1 = vmov 0.0   ;;  %vm1172_vm0 = vmmov 0   ;;  %vm49_vm1 = vcmask 130048   ;;  %s1376_s0 = inlined_call_operand.vmem [shape: f32[8,2,16], index: 0, kind: input, shape index: {}]   ;;  %s1377_s1 = inlined_call_operand.vmem [shape: bf16[48,32], index: 1, kind: input, shape index: {}]   ;;  %s1378_s2 = inlined_call_operand.vmem [shape: f32[34,32], index: 2, kind: input, shape index: {}]   ;;  %s1379_s3 = inlined_call_operand.hbm [shape: f32[2,5], index: 3, kind: output, shape index: {}]  }
   0x1   :  { %v1199_v0 = vld [vmem:[%s1377_s1 + $0x10] sm:$0xff]   ;;  %950 = vmatprep.subr.bf16.mxu0 %v1171_v1  ;;  %v23_v2 = vld [vmem:[%s1376_s0] sm:$0x3]  ;;  %964 = vmatprep.subr.bf16.mxu1 %v1171_v1 }
   0x2   :  { %951 = vmatpush3.bf16.msra.mxu0 %v1199_v0  ;;  %952 = vmatprep.mubr.msk.bf16.mxu0 %vm1172_vm0, %v1171_v1  ;;  %v31_v3 = vpack.c.bf16 %v23_v2, %v23_v2  ;;  %v1212_v4 = vld [vmem:[%s1377_s1] sm:$0xff]  }
   0x3   :  { %956 = vmatprep.subr.bf16.mxu0 %v1171_v1  ;;  %965 = vmatpush3.bf16.msra.mxu1 %v1199_v0 }
   0x4   :  { %966 = vmatprep.mubr.msk.bf16.mxu1 %vm1172_vm0, %v1171_v1  ;;  %970 = vmatprep.subr.bf16.mxu1 %v1171_v1 }
   0x5   :  { %8 = vsyncpa [#allocation3], 0  ;;  %953 = vmatmul.mubr.msk.bf16.vlgmr.msra.gmra.mrb[0].mxu0 %vm49_vm1, %v31_v3  ;;  %v1224_v5 = vld [vmem:[%s1377_s1 + $0x8] sm:$0xff]   ;;  %v1173_v6 = vmov 0   ;;  %v24_v7 = vld [vmem:[%s1376_s0 + $0x2] sm:$0x3] }
   0x6   :  { %957 = vmatpush3.bf16.msra.mxu0 %v1212_v4  ;;  %960 = vmatprep.mubr.msk.bf16.mxu0 %vm1172_vm0, %v1171_v1  ;;  %v32_v8 = vpack.c.bf16 %v24_v7, %v24_v7  ;;  %v1248_v9 = vld [vmem:[%s1378_s2 + $0x21] ss:$0 sm:$0xff]  ;;  %vm105_vm2 = vcmask 261120   ;;  %v25_v17 = vld [vmem:[%s1376_s0 + $0x4] sm:$0x3]  ;;  %vm856_vm3 = vcmask 33792  }
   0x7   :  { %958 = vmatprep.subr.bf16.mxu0 %v1171_v1  ;;  %v33_v18 = vpack.c.bf16 %v25_v17, %v25_v17  ;;  %v26_v26 = vld [vmem:[%s1376_s0 + $0x6] sm:$0x3]  ;;  %v27_v35 = vld [vmem:[%s1376_s0 + $0x8] sm:$0x3]  ;;  %v28_v44 = vld [vmem:[%s1376_s0 + $0xa] sm:$0x3] }
   0x8   :  { %967 = vmatmul.mubr.msk.bf16.vlgmr.msra.gmra.mrb[0].mxu1 %vm49_vm1, %v32_v8  ;;  %v34_v27 = vpack.c.bf16 %v26_v26, %v26_v26  ;;  %v35_v36 = vpack.c.bf16 %v27_v35, %v27_v35  ;;  %v36_v45 = vpack.c.bf16 %v28_v44, %v28_v44  ;;  %v29_v53 = vld [vmem:[%s1376_s0 + $0xc] sm:$0x3]  ;;  %v30_v62 = vld [vmem:[%s1376_s0 + $0xe] sm:$0x3]  ;;  %s1175_s17 = smov [#allocation2]  }
   0x9   :  { %971 = vmatpush3.bf16.msra.mxu1 %v1212_v4  ;;  %974 = vmatprep.mubr.msk.bf16.mxu1 %vm1172_vm0, %v1171_v1  ;;  %v37_v54 = vpack.c.bf16 %v29_v53, %v29_v53  ;;  %v38_v63 = vpack.c.bf16 %v30_v62, %v30_v62 }
   0xa   :  { %959 = vmatpush3.bf16.msra.mxu0 %v1224_v5  ;;  %972 = vmatprep.subr.bf16.mxu1 %v1171_v1 }
   0xb   :  { %978 = vmatprep.subr.bf16.mxu0 %v1171_v1 }
   0xd   :  { %973 = vmatpush3.bf16.msra.mxu1 %v1224_v5 }
   0xe   :  { %992 = vmatprep.subr.bf16.mxu1 %v1171_v1 }
  0x11   :  { %961 = vmatmul.mubr.bf16.vlgmr.msra.gmra.mrb[0].mxu0 %v1173_v6 }
  0x12   :  { %979 = vmatpush3.bf16.msra.mxu0 %v1199_v0  ;;  %980 = vmatprep.mubr.msk.bf16.mxu0 %vm1172_vm0, %v1171_v1 }
  0x13   :  { %984 = vmatprep.subr.bf16.mxu0 %v1171_v1 }
  0x19   :  { %981 = vmatmul.mubr.msk.bf16.vlgmr.msra.gmra.mrb[4].mxu0 %vm49_vm1, %v33_v18 }
  0x1a   :  { %985 = vmatpush3.bf16.msra.mxu0 %v1212_v4  ;;  %988 = vmatprep.mubr.msk.bf16.mxu0 %vm1172_vm0, %v1171_v1 }
  0x1b   :  { %986 = vmatprep.subr.bf16.mxu0 %v1171_v1 }
  0x1e   :  { %987 = vmatpush3.bf16.msra.mxu0 %v1224_v5 }
  0x1f   :  { %1006 = vmatprep.subr.bf16.mxu0 %v1171_v1 }
  0xe4   :  { %v143_v10 = vpop.f32.mrb[0].mxu0 }
  0xe5   :  { %v1079_v11 = vadd.f32 %v1248_v9, %v143_v10  ;;  %v962_v12 = vpop.f32.mrb[1].mxu0 }
  0xe6   :  { %v146_v13 = vpop.f32.mrb[2].mxu0 }
  0xe7   :  { %1127 = vtanh.f32 %v1079_v11  ;;  %v963_v14 = vpop.f32.mrb[3].mxu0  ;;  %v1174_v11 = vmov 0.0|0.0   ;;  %v777_v13 = vld [vmem:[%s1378_s2 + $0x18] sm:$0xff] }
  0xf1   :  { %v1128_v15 = vpop.eup %1127 }
  0xf2   :  { %v194_v16 = vpack.c.bf16 %v1128_v15, %v1128_v15 }
  0xf4   :  { %975 = vmatmul.mubr.msk.bf16.vlgmr.msra.gmra.mrb[0].mxu1 %vm105_vm2, %v194_v16 }
  0xf5   :  { %993 = vmatpush3.bf16.msra.mxu1 %v1199_v0  ;;  %994 = vmatprep.mubr.msk.bf16.mxu1 %vm1172_vm0, %v1171_v1 }
  0xf6   :  { %998 = vmatprep.subr.bf16.mxu1 %v1171_v1 }
  0xfc   :  { %995 = vmatmul.mubr.msk.bf16.vlgmr.msra.gmra.mrb[4].mxu1 %vm49_vm1, %v34_v27 }
  0xfd   :  { %999 = vmatpush3.bf16.msra.mxu1 %v1212_v4  ;;  %1002 = vmatprep.mubr.msk.bf16.mxu1 %vm1172_vm0, %v1171_v1 }
  0xfe   :  { %1000 = vmatprep.subr.bf16.mxu1 %v1171_v1 }
 0x101   :  { %1001 = vmatpush3.bf16.msra.mxu1 %v1224_v5 }
 0x102   :  { %1020 = vmatprep.subr.bf16.mxu1 %v1171_v1 }
 0x1c7   :  { %v232_v19 = vpop.f32.mrb[0].mxu1 }
 0x1c8   :  { %v1080_v20 = vadd.f32 %v1248_v9, %v232_v19  ;;  %v976_v21 = vpop.f32.mrb[1].mxu1 }
 0x1c9   :  { %v235_v22 = vpop.f32.mrb[2].mxu1  ;;  %v903_v21 = vld [vmem:[%s1378_s2 + $0x20] ss:$0 sm:$0xff] }
 0x1ca   :  { %1129 = vtanh.f32 %v1080_v20  ;;  %v977_v23 = vpop.f32.mrb[3].mxu1 }
 0x1d4   :  { %v1130_v24 = vpop.eup %1129 }
 0x1d5   :  { %v283_v25 = vpack.c.bf16 %v1130_v24, %v1130_v24 }
 0x1d7   :  { %989 = vmatmul.mubr.msk.bf16.vlgmr.msra.gmra.mrb[4].mxu0 %vm105_vm2, %v283_v25 }
 0x1d8   :  { %1007 = vmatpush3.bf16.msra.mxu0 %v1199_v0  ;;  %1008 = vmatprep.mubr.msk.bf16.mxu0 %vm1172_vm0, %v1171_v1 }
 0x1d9   :  { %1012 = vmatprep.subr.bf16.mxu0 %v1171_v1 }
 0x1df   :  { %1009 = vmatmul.mubr.msk.bf16.vlgmr.msra.gmra.mrb[8].mxu0 %vm49_vm1, %v35_v36 }
 0x1e0   :  { %1013 = vmatpush3.bf16.msra.mxu0 %v1212_v4  ;;  %1016 = vmatprep.mubr.msk.bf16.mxu0 %vm1172_vm0, %v1171_v1 }
 0x1e1   :  { %1014 = vmatprep.subr.bf16.mxu0 %v1171_v1 }
 0x1e4   :  { %1015 = vmatpush3.bf16.msra.mxu0 %v1224_v5 }
 0x1e5   :  { %1034 = vmatprep.subr.bf16.mxu0 %v1171_v1 }
 0x2aa   :  { %v321_v28 = vpop.f32.mrb[4].mxu0 }
 0x2ab   :  { %v1081_v29 = vadd.f32 %v1248_v9, %v321_v28  ;;  %v990_v30 = vpop.f32.mrb[5].mxu0 }
 0x2ac   :  { %v324_v31 = vpop.f32.mrb[6].mxu0 }
 0x2ad   :  { %1131 = vtanh.f32 %v1081_v29  ;;  %v991_v32 = vpop.f32.mrb[7].mxu0 }
 0x2b7   :  { %v1132_v33 = vpop.eup %1131 }
 0x2b8   :  { %v372_v34 = vpack.c.bf16 %v1132_v33, %v1132_v33 }
 0x2ba   :  { %1003 = vmatmul.mubr.msk.bf16.vlgmr.msra.gmra.mrb[4].mxu1 %vm105_vm2, %v372_v34 }
 0x2bb   :  { %1021 = vmatpush3.bf16.msra.mxu1 %v1199_v0  ;;  %1022 = vmatprep.mubr.msk.bf16.mxu1 %vm1172_vm0, %v1171_v1 }
 0x2bc   :  { %1026 = vmatprep.subr.bf16.mxu1 %v1171_v1 }
 0x2c2   :  { %1023 = vmatmul.mubr.msk.bf16.vlgmr.msra.gmra.mrb[8].mxu1 %vm49_vm1, %v36_v45 }
 0x2c3   :  { %1027 = vmatpush3.bf16.msra.mxu1 %v1212_v4  ;;  %1030 = vmatprep.mubr.msk.bf16.mxu1 %vm1172_vm0, %v1171_v1 }
 0x2c4   :  { %1028 = vmatprep.subr.bf16.mxu1 %v1171_v1 }
 0x2c7   :  { %1029 = vmatpush3.bf16.msra.mxu1 %v1224_v5 }
 0x2c8   :  { %1048 = vmatprep.subr.bf16.mxu1 %v1171_v1 }
 0x38d   :  { %v410_v37 = vpop.f32.mrb[4].mxu1 }
 0x38e   :  { %v1082_v38 = vadd.f32 %v1248_v9, %v410_v37  ;;  %v1004_v39 = vpop.f32.mrb[5].mxu1 }
 0x38f   :  { %v413_v40 = vpop.f32.mrb[6].mxu1 }
 0x390   :  { %1133 = vtanh.f32 %v1082_v38  ;;  %v1005_v41 = vpop.f32.mrb[7].mxu1 }
 0x39a   :  { %v1134_v42 = vpop.eup %1133 }
 0x39b   :  { %v461_v43 = vpack.c.bf16 %v1134_v42, %v1134_v42 }
 0x39d   :  { %1017 = vmatmul.mubr.msk.bf16.vlgmr.msra.gmra.mrb[8].mxu0 %vm105_vm2, %v461_v43 }
 0x39e   :  { %1035 = vmatpush3.bf16.msra.mxu0 %v1199_v0  ;;  %1036 = vmatprep.mubr.msk.bf16.mxu0 %vm1172_vm0, %v1171_v1 }
 0x39f   :  { %1040 = vmatprep.subr.bf16.mxu0 %v1171_v1 }
 0x3a5   :  { %1037 = vmatmul.mubr.msk.bf16.vlgmr.msra.gmra.mrb[12].mxu0 %vm49_vm1, %v37_v54 }
 0x3a6   :  { %1041 = vmatpush3.bf16.msra.mxu0 %v1212_v4  ;;  %1044 = vmatprep.mubr.msk.bf16.mxu0 %vm1172_vm0, %v1171_v1 }
 0x3a7   :  { %1042 = vmatprep.subr.bf16.mxu0 %v1171_v1 }
 0x3aa   :  { %1043 = vmatpush3.bf16.msra.mxu0 %v1224_v5 }
 0x3ab   :  { %1073 = vmatprep.subr.bf16.mxu0 %v1174_v11 }
 0x470   :  { %v499_v46 = vpop.f32.mrb[8].mxu0 }
 0x471   :  { %v1083_v47 = vadd.f32 %v1248_v9, %v499_v46  ;;  %v1018_v48 = vpop.f32.mrb[9].mxu0 }
 0x472   :  { %v502_v49 = vpop.f32.mrb[10].mxu0 }
 0x473   :  { %1135 = vtanh.f32 %v1083_v47  ;;  %v1019_v50 = vpop.f32.mrb[11].mxu0 }
 0x47d   :  { %v1136_v51 = vpop.eup %1135 }
 0x47e   :  { %v550_v52 = vpack.c.bf16 %v1136_v51, %v1136_v51 }
 0x480   :  { %1031 = vmatmul.mubr.msk.bf16.vlgmr.msra.gmra.mrb[8].mxu1 %vm105_vm2, %v550_v52 }
 0x481   :  { %1049 = vmatpush3.bf16.msra.mxu1 %v1199_v0  ;;  %1050 = vmatprep.mubr.msk.bf16.mxu1 %vm1172_vm0, %v1171_v1 }
 0x482   :  { %1054 = vmatprep.subr.bf16.mxu1 %v1171_v1 }
 0x488   :  { %1051 = vmatmul.mubr.msk.bf16.vlgmr.msra.gmra.mrb[12].mxu1 %vm49_vm1, %v38_v63 }
 0x489   :  { %1055 = vmatpush3.bf16.msra.mxu1 %v1212_v4  ;;  %1058 = vmatprep.mubr.msk.bf16.mxu1 %vm1172_vm0, %v1171_v1  ;;  %v774_v4 = vld [vmem:[%s1378_s2] sm:$0xff] }
 0x48a   :  { %1056 = vmatprep.subr.bf16.mxu1 %v1171_v1 }
 0x48d   :  { %1057 = vmatpush3.bf16.msra.mxu1 %v1224_v5  ;;  %v776_v5 = vld [vmem:[%s1378_s2 + $0x10] sm:$0xff] }
 0x48e   :  { %v1077_v14 = vpack.c.bf16 %v777_v13, %v776_v5 }
 0x553   :  { %v588_v55 = vpop.f32.mrb[8].mxu1 }
 0x554   :  { %v1084_v56 = vadd.f32 %v1248_v9, %v588_v55  ;;  %v1032_v57 = vpop.f32.mrb[9].mxu1 }
 0x555   :  { %v591_v58 = vpop.f32.mrb[10].mxu1 }
 0x556   :  { %1137 = vtanh.f32 %v1084_v56  ;;  %v1033_v59 = vpop.f32.mrb[11].mxu1 }
 0x560   :  { %v1138_v60 = vpop.eup %1137 }
 0x561   :  { %v639_v61 = vpack.c.bf16 %v1138_v60, %v1138_v60 }
 0x563   :  { %1045 = vmatmul.mubr.msk.bf16.vlgmr.msra.gmra.mrb[12].mxu0 %vm105_vm2, %v639_v61 }
 0x564   :  { %1070 = vmatprep.mubr.msk.f32.mxu0 %vm1172_vm0, %v1171_v1  ;;  %v775_v1 = vld [vmem:[%s1378_s2 + $0x8] sm:$0xff]  ;;  %s876_s2 = sshll.u32 %s1175_s17, 4  ;;  %s877_s2 = int_to_ptr.vmem [resolvable:$true] %s876_s2 }
 0x565   :  { %v1074_v12 = vpack.c.bf16 %v775_v1, %v774_v4  ;;  %s1147_s18 = scalar_lea.vmem %s877_s2, 32  ;;  %p1152_p1 = scmp.lt.s32.totalorder %s877_s2, %s877_s2 }
 0x566   :  { %p1148_p0 = scmp.ne.s32.totalorder %s877_s2, %s1147_s18  ;;  %p1153_p2 = scmp.lt.s32.totalorder %s1147_s18, %s1147_s18 }
 0x567   :  { %1075 = vmatpush3.bf16.msra.mxu0 %v1074_v12 }
 0x568   :  { %1076 = vmatprep.subr.bf16.mxu0 %v1174_v11  ;;  %p1154_p3 = por %p1153_p2, %p1152_p1 }
 0x56a   :  { %p1155_p4 = pnand %p1154_p3, %p1148_p0 }
 0x56b   :  { %1078 = vmatpush3.bf16.msra.mxu0 %v1077_v14 }
 0x636   :  { %v677_v0 = vpop.f32.mrb[12].mxu0 }
 0x637   :  { %v1085_v2 = vadd.f32 %v1248_v9, %v677_v0  ;;  %v1046_v3 = vpop.f32.mrb[13].mxu0 }
 0x638   :  { %v680_v6 = vpop.f32.mrb[14].mxu0 }
 0x639   :  { %1139 = vtanh.f32 %v1085_v2  ;;  %v1047_v7 = vpop.f32.mrb[15].mxu0 }
 0x643   :  { %v1140_v8 = vpop.eup %1139 }
 0x644   :  { %v728_v10 = vpack.c.bf16 %v1140_v8, %v1140_v8 }
 0x646   :  { %1059 = vmatmul.mubr.msk.bf16.vlgmr.msra.gmra.mrb[12].mxu1 %vm105_vm2, %v728_v10 }
 0x719   :  { %v766_v15 = vpop.f32.mrb[12].mxu1 }
 0x71a   :  { %v1086_v16 = vadd.f32 %v1248_v9, %v766_v15  ;;  %v1060_v17 = vpop.f32.mrb[13].mxu1 }
 0x71b   :  { %v769_v18 = vpop.f32.mrb[14].mxu1 }
 0x71c   :  { %1141 = vtanh.f32 %v1086_v16  ;;  %v1061_v19 = vpop.f32.mrb[15].mxu1 }
 0x726   :  { %v1142_v20 = vpop.eup %1141 }
 0x727   :  { %1071 = vmatmul.mubr.msk.f32.vlgmr.msra.gmra.mrb[16].mxu0 %vm105_vm2, %v1142_v20 }
 0x7fa   :  { %v852_v22 = vpop.f32.mrb[16].mxu0 }
 0x7fb   :  { %v853_v23 = vadd.f32 %v903_v21, %v852_v22  ;;  %v1072_v24 = vpop.f32.mrb[17].mxu0 }
 0x7fd   :  { %v857_v25 = vsel %vm856_vm3, %v853_v23, -inf }
 0x7fe   :  { %858 = vmax.xlane.f32.xlu0 %v857_v25 }
 0x88b   :  { %v859_v26 = vpop.xlane.xlu0 %858 }
 0x88c   :  { %v860_v9 = vsub.f32 %v853_v23, %v859_v26 }
 0x88e   :  { %v861_v27 = vmul.f32 1.442695, %v860_v9 }
 0x890   :  { %1143 = vpow2.f32 %v861_v27 }
 0x89a   :  { %v1144_v28 = vpop.eup %1143 }
 0x89b   :  { %v863_v29 = vsel %vm856_vm3, %v1144_v28, 0.0 }
 0x89c   :  { %864 = vadd.xlane.f32.xlu0 %v863_v29 }
 0x929   :  { %v865_v30 = vpop.xlane.xlu0 %864 }
 0x92a   :  { %1145 = vlog2.f32 %v865_v30 }
 0x934   :  { %v1146_v31 = vpop.eup %1145 }
 0x935   :  { %v867_v32 = vmul.f32 0.6931472, %v1146_v31 }
 0x937   :  { %v868_v33 = vsub.f32 %v860_v9, %v867_v32 }
 0x939   :  { %869 = vst.msk [vmem:[#allocation2] sm:$0x3] %vm856_vm3, %v868_v33 }
 0x93a   :  { %1158 = shalt.err (!%p1155_p4)
}
 0x93b   :  { %s1159_s20 = scalar_lea.hbm %s1379_s3, 32 }
 0x93c   :  { %p1160_p5 = scmp.ne.s32.totalorder %s1379_s3, %s1159_s20  ;;  %p1163_p6 = scmp.lt.u32.totalorder %s1159_s20, %s1379_s3 }
 0x93e   :  { %p1165_p7 = pnand %p1163_p6, %p1160_p5 }
 0x940   :  { %1168 = shalt.err (!%p1165_p7)
}
 0x941   :  { %879 = dma.vmem_to_hbm [thread:$0]  %s877_s2, 32, %s1379_s3, [#allocation3]  }
 0x942   :  { %1169 = dma.done.wait [#allocation3], 32  }
 0x943   :  { %1170 = vsyncadd [#allocation3], 4294967264 }
 0x944   :  { %883 = vsyncpa [#allocation3], 1 }

</bundles_post_ra>
